<compile_context>
chip_gen: v5e
topology: v5e:2x2
jax: 0.10.0
libtpu: 0.0.40
codegen_flags: <defaults>
</compile_context>

<pallas_src>
import functools

import jax
import jax.numpy as jnp
from jax.experimental import pallas as pl
from jax.experimental.pallas import tpu as pltpu

_LN_EPS = 1e-12


def _branch(x, res_f32, w, b, gamma, beta, matmul_dtype, out_dtype):
    """dense (x @ W, W pre-transposed to [in, out]) + bias + residual + LayerNorm."""
    if matmul_dtype is not None:
        x = x.astype(matmul_dtype)          # weights were pre-cast in the wrapper
    y = jnp.dot(x, w, preferred_element_type=jnp.float32)
    y = y + b.astype(jnp.float32) + res_f32
    # dropout: identity at inference time.
    mean = jnp.mean(y, axis=-1, keepdims=True)
    centered = y - mean
    var = jnp.mean(centered * centered, axis=-1, keepdims=True)
    inv = jax.lax.rsqrt(var + _LN_EPS)
    out = centered * inv * gamma.astype(jnp.float32) + beta.astype(jnp.float32)
    return out.astype(out_dtype)


def _kernel_shared_res(x1_ref, x2_ref, res_ref,
                       w1_ref, b1_ref, g1_ref, be1_ref,
                       w2_ref, b2_ref, g2_ref, be2_ref,
                       o1_ref, o2_ref, *, matmul_dtype):
    # Shared residual: one DMA / one f32 cast, reused by both branches.
    res = res_ref[...].astype(jnp.float32)
    o1_ref[...] = _branch(x1_ref[...], res, w1_ref[...], b1_ref[...],
                          g1_ref[...], be1_ref[...], matmul_dtype, o1_ref.dtype)
    o2_ref[...] = _branch(x2_ref[...], res, w2_ref[...], b2_ref[...],
                          g2_ref[...], be2_ref[...], matmul_dtype, o2_ref.dtype)


def _kernel_split_res(x1_ref, x2_ref, res1_ref, res2_ref,
                      w1_ref, b1_ref, g1_ref, be1_ref,
                      w2_ref, b2_ref, g2_ref, be2_ref,
                      o1_ref, o2_ref, *, matmul_dtype):
    o1_ref[...] = _branch(x1_ref[...], res1_ref[...].astype(jnp.float32),
                          w1_ref[...], b1_ref[...], g1_ref[...], be1_ref[...],
                          matmul_dtype, o1_ref.dtype)
    o2_ref[...] = _branch(x2_ref[...], res2_ref[...].astype(jnp.float32),
                          w2_ref[...], b2_ref[...], g2_ref[...], be2_ref[...],
                          matmul_dtype, o2_ref.dtype)


def bert_self_output(hidden_states, input_tensor, params, *,
                     row_tile=512, matmul_dtype=jnp.bfloat16):
    """Mirror of BertSelfOutput.forward.

    hidden_states: tuple (hs1, hs2) of [B, S, H] arrays.
    input_tensor: single [B, S, H] array (shared residual) or list/tuple of two.
    params: dict with w1/b1, w2/b2 (dense, PyTorch [out, in] layout),
            gamma1/beta1, gamma2/beta2 (LayerNorm).
    matmul_dtype: dtype for the MXU matmul (None keeps input dtype, e.g. f32).
    """
    hs1, hs2 = hidden_states
    B, S, H = hs1.shape
    N = B * S
    # Production H should be a multiple of 128 (768/1024) for lane-dense
    # unmasked stores; a full-H block is still legal otherwise (demo H=32).

    x1 = hs1.reshape(N, H)                    # views, no HBM copy
    x2 = hs2.reshape(N, H)

    shared_res = not isinstance(input_tensor, (list, tuple))
    if shared_res:
        residuals = (input_tensor.reshape(N, H),)
    else:
        residuals = (input_tensor[0].reshape(N, H), input_tensor[1].reshape(N, H))

    # Pre-transpose ([in, out]) + pre-cast the weights ONCE (tiny [H,H] cost),
    # so the kernel does a plain MXU matmul with no per-tile transpose/cast
    # and weight DMA bytes are halved in bf16.
    w_dt = matmul_dtype if matmul_dtype is not None else x1.dtype
    w1 = params["w1"].T.astype(w_dt)
    w2 = params["w2"].T.astype(w_dt)
    b1 = params["b1"].reshape(1, H)
    b2 = params["b2"].reshape(1, H)
    g1 = params["gamma1"].reshape(1, H)
    g2 = params["gamma2"].reshape(1, H)
    be1 = params["beta1"].reshape(1, H)
    be2 = params["beta2"].reshape(1, H)

    tn = N if N <= row_tile else row_tile     # multiple of 8 at production sizes
    n_row_tiles = pl.cdiv(N, tn)

    row_spec = pl.BlockSpec((tn, H), lambda i: (i, 0))
    w_spec = pl.BlockSpec((H, H), lambda i: (0, 0))       # resident across tiles
    p_spec = pl.BlockSpec((1, H), lambda i: (0, 0))

    in_specs = ([row_spec, row_spec]                        # x1, x2
                + [row_spec] * len(residuals)               # residual(s)
                + [w_spec, p_spec, p_spec, p_spec,          # w1, b1, gamma1, beta1
                   w_spec, p_spec, p_spec, p_spec])         # w2, b2, gamma2, beta2

    kernel_fn = _kernel_shared_res if shared_res else _kernel_split_res
    kernel = functools.partial(kernel_fn, matmul_dtype=matmul_dtype)

    act_item = jnp.dtype(x1.dtype).itemsize
    w_item = jnp.dtype(w_dt).itemsize

    # VMEM footprint estimate (double-buffered blocks) -> scoped-VMEM limit,
    # so v5e's 16 MiB default doesn't de-pipeline and v7x's 64 MiB is respected.
    vmem_est = ((2 + len(residuals) + 2) * 2 * tn * H * act_item   # x1,x2,res,out1,out2
                + 2 * 2 * H * H * w_item                           # both weights
                + 6 * 2 * H * act_item)                            # bias/gamma/beta
    vmem_limit = max(32 << 20, min(int(vmem_est * 1.25) + (4 << 20), 100 << 20))

    cost = pl.CostEstimate(
        flops=2 * 2 * N * H * H,
        transcendentals=2 * N,
        bytes_accessed=((4 + len(residuals)) * N * H * act_item
                        + 2 * H * H * w_item + 6 * H * act_item),
    )

    out1, out2 = pl.pallas_call(
        kernel,
        out_shape=(jax.ShapeDtypeStruct((N, H), x1.dtype),
                   jax.ShapeDtypeStruct((N, H), x2.dtype)),
        grid=(n_row_tiles,),
        in_specs=in_specs,
        out_specs=(row_spec, row_spec),
        compiler_params=pltpu.CompilerParams(
            dimension_semantics=("parallel",),
            vmem_limit_bytes=vmem_limit),
        cost_estimate=cost,
    )(x1, x2, *residuals, w1, b1, g1, be1, w2, b2, g2, be2)

    return [out1.reshape(B, S, H), out2.reshape(B, S, H)]


def _ref_branch(x, res, w, b, gamma, beta):
    y = x @ w.T + b + res
    mean = y.mean(-1, keepdims=True)
    var = ((y - mean) ** 2).mean(-1, keepdims=True)
    return (y - mean) / jnp.sqrt(var + _LN_EPS) * gamma + beta


if __name__ == "__main__":
    B, S, H = 2, 8, 32

    key = jax.random.PRNGKey(0)
    keys = jax.random.split(key, 12)

    hs1 = jax.random.normal(keys[0], (B, S, H), dtype=jnp.float32)
    hs2 = jax.random.normal(keys[1], (B, S, H), dtype=jnp.float32)
    inp = jax.random.normal(keys[2], (B, S, H), dtype=jnp.float32)
    inp2 = jax.random.normal(keys[11], (B, S, H), dtype=jnp.float32)

    scale = 1.0 / jnp.sqrt(H)
    params = {
        "w1": jax.random.uniform(keys[3], (H, H), jnp.float32, -scale, scale),
        "b1": jax.random.uniform(keys[4], (H,), jnp.float32, -scale, scale),
        "w2": jax.random.uniform(keys[5], (H, H), jnp.float32, -scale, scale),
        "b2": jax.random.uniform(keys[6], (H,), jnp.float32, -scale, scale),
        "gamma1": 1.0 + 0.1 * jax.random.normal(keys[7], (H,), jnp.float32),
        "beta1": 0.1 * jax.random.normal(keys[8], (H,), jnp.float32),
        "gamma2": 1.0 + 0.1 * jax.random.normal(keys[9], (H,), jnp.float32),
        "beta2": 0.1 * jax.random.normal(keys[10], (H,), jnp.float32),
    }

    ref1 = _ref_branch(hs1, inp, params["w1"], params["b1"],
                       params["gamma1"], params["beta1"])
    ref2 = _ref_branch(hs2, inp, params["w2"], params["b2"],
                       params["gamma2"], params["beta2"])
    ref2_split = _ref_branch(hs2, inp2, params["w2"], params["b2"],
                             params["gamma2"], params["beta2"])

    # 1) Shared residual, pure-f32 matmul path (tight tolerance vs f32 ref).
    out1, out2 = bert_self_output((hs1, hs2), inp, params, matmul_dtype=None)
    jax.block_until_ready(out1)
    jax.block_until_ready(out2)
    assert out1.shape == (B, S, H) and out2.shape == (B, S, H)
    assert jnp.allclose(out1, ref1, atol=1e-4, rtol=1e-4), "f32 branch 1 mismatch"
    assert jnp.allclose(out2, ref2, atol=1e-4, rtol=1e-4), "f32 branch 2 mismatch"

    # 2) Separate residuals, default bf16-MXU path (looser tolerance vs f32 ref).
    out1b, out2b = bert_self_output((hs1, hs2), [inp, inp2], params)
    jax.block_until_ready(out1b)
    jax.block_until_ready(out2b)
    assert jnp.allclose(out1b, ref1, atol=2e-2, rtol=2e-2), "bf16 branch 1 mismatch"
    assert jnp.allclose(out2b, ref2_split, atol=2e-2, rtol=2e-2), "bf16 branch 2 mismatch"

    print("KERNEL_OK")
</pallas_src>

<mosaic_0001>
module attributes {stable_mosaic.version = 11 : i64} {
  func.func @_kernel_shared_res(%arg0: i32, %arg1: memref<16x32xf32, #tpu.memory_space<vmem>>, %arg2: memref<16x32xf32, #tpu.memory_space<vmem>>, %arg3: memref<16x32xf32, #tpu.memory_space<vmem>>, %arg4: memref<32x32xf32, #tpu.memory_space<vmem>>, %arg5: memref<1x32xf32, #tpu.memory_space<vmem>>, %arg6: memref<1x32xf32, #tpu.memory_space<vmem>>, %arg7: memref<1x32xf32, #tpu.memory_space<vmem>>, %arg8: memref<32x32xf32, #tpu.memory_space<vmem>>, %arg9: memref<1x32xf32, #tpu.memory_space<vmem>>, %arg10: memref<1x32xf32, #tpu.memory_space<vmem>>, %arg11: memref<1x32xf32, #tpu.memory_space<vmem>>, %arg12: memref<16x32xf32, #tpu.memory_space<vmem>>, %arg13: memref<16x32xf32, #tpu.memory_space<vmem>>) attributes {dimension_semantics = [#tpu.dimension_semantics<parallel>], iteration_bounds = array<i64: 1>, scalar_prefetch = 0 : i64, scratch_operands = 0 : i64, tpu.core_type = #tpu.core_type<tc>, window_params = [{transform_indices = @transform_0, window_bounds = array<i64: 16, 32>}, {transform_indices = @transform_1, window_bounds = array<i64: 16, 32>}, {transform_indices = @transform_2, window_bounds = array<i64: 16, 32>}, {pipeline_mode = #tpu.pipeline_mode<synchronous>, transform_indices = @transform_3, window_bounds = array<i64: 32, 32>}, {pipeline_mode = #tpu.pipeline_mode<synchronous>, transform_indices = @transform_4, window_bounds = array<i64: 1, 32>}, {pipeline_mode = #tpu.pipeline_mode<synchronous>, transform_indices = @transform_5, window_bounds = array<i64: 1, 32>}, {pipeline_mode = #tpu.pipeline_mode<synchronous>, transform_indices = @transform_6, window_bounds = array<i64: 1, 32>}, {pipeline_mode = #tpu.pipeline_mode<synchronous>, transform_indices = @transform_7, window_bounds = array<i64: 32, 32>}, {pipeline_mode = #tpu.pipeline_mode<synchronous>, transform_indices = @transform_8, window_bounds = array<i64: 1, 32>}, {pipeline_mode = #tpu.pipeline_mode<synchronous>, transform_indices = @transform_9, window_bounds = array<i64: 1, 32>}, {pipeline_mode = #tpu.pipeline_mode<synchronous>, transform_indices = @transform_10, window_bounds = array<i64: 1, 32>}, {transform_indices = @transform_11, window_bounds = array<i64: 16, 32>}, {transform_indices = @transform_12, window_bounds = array<i64: 16, 32>}]} {
    %c0 = arith.constant 0 : index
    %c0_0 = arith.constant 0 : index
    %0 = vector.load %arg3[%c0, %c0_0] : memref<16x32xf32, #tpu.memory_space<vmem>>, vector<16x32xf32>
    %c0_1 = arith.constant 0 : index
    %c0_2 = arith.constant 0 : index
    %1 = vector.load %arg1[%c0_1, %c0_2] : memref<16x32xf32, #tpu.memory_space<vmem>>, vector<16x32xf32>
    %c0_3 = arith.constant 0 : index
    %c0_4 = arith.constant 0 : index
    %2 = vector.load %arg4[%c0_3, %c0_4] : memref<32x32xf32, #tpu.memory_space<vmem>>, vector<32x32xf32>
    %c0_5 = arith.constant 0 : index
    %c0_6 = arith.constant 0 : index
    %3 = vector.load %arg5[%c0_5, %c0_6] : memref<1x32xf32, #tpu.memory_space<vmem>>, vector<1x32xf32>
    %c0_7 = arith.constant 0 : index
    %c0_8 = arith.constant 0 : index
    %4 = vector.load %arg6[%c0_7, %c0_8] : memref<1x32xf32, #tpu.memory_space<vmem>>, vector<1x32xf32>
    %c0_9 = arith.constant 0 : index
    %c0_10 = arith.constant 0 : index
    %5 = vector.load %arg7[%c0_9, %c0_10] : memref<1x32xf32, #tpu.memory_space<vmem>>, vector<1x32xf32>
    %cst = arith.constant dense<0.000000e+00> : vector<16x32xf32>
    %6 = tpu.matmul %1, %2, %cst {dimension_numbers = #tpu.dot_dimension_numbers<[1], [0], [0], [1], [0, 0, 1, 1], [], []>} : vector<16x32xf32>, vector<32x32xf32>, vector<16x32xf32> -> vector<16x32xf32>
    %7 = vector.broadcast %3 : vector<1x32xf32> to vector<16x32xf32>
    %8 = arith.addf %6, %7 : vector<16x32xf32>
    %9 = arith.addf %8, %0 : vector<16x32xf32>
    %cst_11 = arith.constant dense<0.000000e+00> : vector<16xf32>
    %10 = vector.multi_reduction <add>, %9, %cst_11 [1] : vector<16x32xf32> to vector<16xf32>
    %11 = vector.shape_cast %10 : vector<16xf32> to vector<16x1xf32>
    %cst_12 = arith.constant 3.200000e+01 : f32
    %12 = vector.broadcast %cst_12 : f32 to vector<16x1xf32>
    %13 = arith.divf %11, %12 : vector<16x1xf32>
    %14 = vector.broadcast %13 : vector<16x1xf32> to vector<16x32xf32>
    %15 = arith.subf %9, %14 : vector<16x32xf32>
    %16 = arith.mulf %15, %15 : vector<16x32xf32>
    %cst_13 = arith.constant dense<0.000000e+00> : vector<16xf32>
    %17 = vector.multi_reduction <add>, %16, %cst_13 [1] : vector<16x32xf32> to vector<16xf32>
    %18 = vector.shape_cast %17 : vector<16xf32> to vector<16x1xf32>
    %cst_14 = arith.constant 3.200000e+01 : f32
    %19 = vector.broadcast %cst_14 : f32 to vector<16x1xf32>
    %20 = arith.divf %18, %19 : vector<16x1xf32>
    %cst_15 = arith.constant 9.99999996E-13 : f32
    %21 = vector.broadcast %cst_15 : f32 to vector<16x1xf32>
    %22 = arith.addf %20, %21 : vector<16x1xf32>
    %23 = math.rsqrt %22 : vector<16x1xf32>
    %24 = vector.broadcast %23 : vector<16x1xf32> to vector<16x32xf32>
    %25 = arith.mulf %15, %24 : vector<16x32xf32>
    %26 = vector.broadcast %4 : vector<1x32xf32> to vector<16x32xf32>
    %27 = arith.mulf %25, %26 : vector<16x32xf32>
    %28 = vector.broadcast %5 : vector<1x32xf32> to vector<16x32xf32>
    %29 = arith.addf %27, %28 : vector<16x32xf32>
    %c0_16 = arith.constant 0 : index
    %c0_17 = arith.constant 0 : index
    %30 = vector.load %arg12[%c0_16, %c0_17] : memref<16x32xf32, #tpu.memory_space<vmem>>, vector<16x32xf32>
    tpu.vector_store %arg12[%c0_16, %c0_17], %29 {strides = array<i32>} : memref<16x32xf32, #tpu.memory_space<vmem>>, vector<16x32xf32>,
    %c0_18 = arith.constant 0 : index
    %c0_19 = arith.constant 0 : index
    %31 = vector.load %arg2[%c0_18, %c0_19] : memref<16x32xf32, #tpu.memory_space<vmem>>, vector<16x32xf32>
    %c0_20 = arith.constant 0 : index
    %c0_21 = arith.constant 0 : index
    %32 = vector.load %arg8[%c0_20, %c0_21] : memref<32x32xf32, #tpu.memory_space<vmem>>, vector<32x32xf32>
    %c0_22 = arith.constant 0 : index
    %c0_23 = arith.constant 0 : index
    %33 = vector.load %arg9[%c0_22, %c0_23] : memref<1x32xf32, #tpu.memory_space<vmem>>, vector<1x32xf32>
    %c0_24 = arith.constant 0 : index
    %c0_25 = arith.constant 0 : index
    %34 = vector.load %arg10[%c0_24, %c0_25] : memref<1x32xf32, #tpu.memory_space<vmem>>, vector<1x32xf32>
    %c0_26 = arith.constant 0 : index
    %c0_27 = arith.constant 0 : index
    %35 = vector.load %arg11[%c0_26, %c0_27] : memref<1x32xf32, #tpu.memory_space<vmem>>, vector<1x32xf32>
    %cst_28 = arith.constant dense<0.000000e+00> : vector<16x32xf32>
    %36 = tpu.matmul %31, %32, %cst_28 {dimension_numbers = #tpu.dot_dimension_numbers<[1], [0], [0], [1], [0, 0, 1, 1], [], []>} : vector<16x32xf32>, vector<32x32xf32>, vector<16x32xf32> -> vector<16x32xf32>
    %37 = vector.broadcast %33 : vector<1x32xf32> to vector<16x32xf32>
    %38 = arith.addf %36, %37 : vector<16x32xf32>
    %39 = arith.addf %38, %0 : vector<16x32xf32>
    %cst_29 = arith.constant dense<0.000000e+00> : vector<16xf32>
    %40 = vector.multi_reduction <add>, %39, %cst_29 [1] : vector<16x32xf32> to vector<16xf32>
    %41 = vector.shape_cast %40 : vector<16xf32> to vector<16x1xf32>
    %cst_30 = arith.constant 3.200000e+01 : f32
    %42 = vector.broadcast %cst_30 : f32 to vector<16x1xf32>
    %43 = arith.divf %41, %42 : vector<16x1xf32>
    %44 = vector.broadcast %43 : vector<16x1xf32> to vector<16x32xf32>
    %45 = arith.subf %39, %44 : vector<16x32xf32>
    %46 = arith.mulf %45, %45 : vector<16x32xf32>
    %cst_31 = arith.constant dense<0.000000e+00> : vector<16xf32>
    %47 = vector.multi_reduction <add>, %46, %cst_31 [1] : vector<16x32xf32> to vector<16xf32>
    %48 = vector.shape_cast %47 : vector<16xf32> to vector<16x1xf32>
    %cst_32 = arith.constant 3.200000e+01 : f32
    %49 = vector.broadcast %cst_32 : f32 to vector<16x1xf32>
    %50 = arith.divf %48, %49 : vector<16x1xf32>
    %cst_33 = arith.constant 9.99999996E-13 : f32
    %51 = vector.broadcast %cst_33 : f32 to vector<16x1xf32>
    %52 = arith.addf %50, %51 : vector<16x1xf32>
    %53 = math.rsqrt %52 : vector<16x1xf32>
    %54 = vector.broadcast %53 : vector<16x1xf32> to vector<16x32xf32>
    %55 = arith.mulf %45, %54 : vector<16x32xf32>
    %56 = vector.broadcast %34 : vector<1x32xf32> to vector<16x32xf32>
    %57 = arith.mulf %55, %56 : vector<16x32xf32>
    %58 = vector.broadcast %35 : vector<1x32xf32> to vector<16x32xf32>
    %59 = arith.addf %57, %58 : vector<16x32xf32>
    %c0_34 = arith.constant 0 : index
    %c0_35 = arith.constant 0 : index
    %60 = vector.load %arg13[%c0_34, %c0_35] : memref<16x32xf32, #tpu.memory_space<vmem>>, vector<16x32xf32>
    tpu.vector_store %arg13[%c0_34, %c0_35], %59 {strides = array<i32>} : memref<16x32xf32, #tpu.memory_space<vmem>>, vector<16x32xf32>,
    return
  }
  func.func @transform_0(%arg0: i32) -> (i32, i32) {
    %c0_i32 = arith.constant 0 : i32
    %c0_i32_0 = arith.constant 0 : i32
    return %arg0, %c0_i32 : i32, i32
  }
  func.func @transform_1(%arg0: i32) -> (i32, i32) {
    %c0_i32 = arith.constant 0 : i32
    %c0_i32_0 = arith.constant 0 : i32
    return %arg0, %c0_i32 : i32, i32
  }
  func.func @transform_2(%arg0: i32) -> (i32, i32) {
    %c0_i32 = arith.constant 0 : i32
    %c0_i32_0 = arith.constant 0 : i32
    return %arg0, %c0_i32 : i32, i32
  }
  func.func @transform_3(%arg0: i32) -> (i32, i32) {
    %c0_i32 = arith.constant 0 : i32
    %c0_i32_0 = arith.constant 0 : i32
    %c0_i32_1 = arith.constant 0 : i32
    return %c0_i32, %c0_i32_0 : i32, i32
  }
  func.func @transform_4(%arg0: i32) -> (i32, i32) {
    %c0_i32 = arith.constant 0 : i32
    %c0_i32_0 = arith.constant 0 : i32
    %c0_i32_1 = arith.constant 0 : i32
    return %c0_i32, %c0_i32_0 : i32, i32
  }
  func.func @transform_5(%arg0: i32) -> (i32, i32) {
    %c0_i32 = arith.constant 0 : i32
    %c0_i32_0 = arith.constant 0 : i32
    %c0_i32_1 = arith.constant 0 : i32
    return %c0_i32, %c0_i32_0 : i32, i32
  }
  func.func @transform_6(%arg0: i32) -> (i32, i32) {
    %c0_i32 = arith.constant 0 : i32
    %c0_i32_0 = arith.constant 0 : i32
    %c0_i32_1 = arith.constant 0 : i32
    return %c0_i32, %c0_i32_0 : i32, i32
  }
  func.func @transform_7(%arg0: i32) -> (i32, i32) {
    %c0_i32 = arith.constant 0 : i32
    %c0_i32_0 = arith.constant 0 : i32
    %c0_i32_1 = arith.constant 0 : i32
    return %c0_i32, %c0_i32_0 : i32, i32
  }
  func.func @transform_8(%arg0: i32) -> (i32, i32) {
    %c0_i32 = arith.constant 0 : i32
    %c0_i32_0 = arith.constant 0 : i32
    %c0_i32_1 = arith.constant 0 : i32
    return %c0_i32, %c0_i32_0 : i32, i32
  }
  func.func @transform_9(%arg0: i32) -> (i32, i32) {
    %c0_i32 = arith.constant 0 : i32
    %c0_i32_0 = arith.constant 0 : i32
    %c0_i32_1 = arith.constant 0 : i32
    return %c0_i32, %c0_i32_0 : i32, i32
  }
  func.func @transform_10(%arg0: i32) -> (i32, i32) {
    %c0_i32 = arith.constant 0 : i32
    %c0_i32_0 = arith.constant 0 : i32
    %c0_i32_1 = arith.constant 0 : i32
    return %c0_i32, %c0_i32_0 : i32, i32
  }
  func.func @transform_11(%arg0: i32) -> (i32, i32) {
    %c0_i32 = arith.constant 0 : i32
    %c0_i32_0 = arith.constant 0 : i32
    return %arg0, %c0_i32 : i32, i32
  }
  func.func @transform_12(%arg0: i32) -> (i32, i32) {
    %c0_i32 = arith.constant 0 : i32
    %c0_i32_0 = arith.constant 0 : i32
    return %arg0, %c0_i32 : i32, i32
  }
}

</mosaic_0001>

<bundles_post_ra>
// kernel: tpu_custom_call.1
= control target key start
LH: loop header
LB: loop body
LE: loop exit
PB: predicated region body
PF: predicated region fallthrough
CT: control target
= control target key end

     0   :  { %18 = vsyncpa [#allocation3], 0  ;;  %s749_s0 = inlined_call_operand.hbm [shape: f32[16,32], index: 0, kind: input, shape index: {}]   ;;  %s750_s1 = inlined_call_operand.hbm [shape: f32[16,32], index: 1, kind: input, shape index: {}]   ;;  %s751_s2 = inlined_call_operand.hbm [shape: f32[16,32], index: 2, kind: input, shape index: {}]   ;;  %s752_s3 = inlined_call_operand.hbm [shape: f32[32,32], index: 3, kind: input, shape index: {}]   ;;  %s753_s4 = inlined_call_operand.vmem [shape: f32[1,32], index: 4, kind: input, shape index: {}]   ;;  %s754_s5 = inlined_call_operand.vmem [shape: f32[1,32], index: 5, kind: input, shape index: {}]   ;;  %s755_s6 = inlined_call_operand.vmem [shape: f32[1,32], index: 6, kind: input, shape index: {}]   ;;  %s756_s7 = inlined_call_operand.hbm [shape: f32[32,32], index: 7, kind: input, shape index: {}]   ;;  %s757_s8 = inlined_call_operand.vmem [shape: f32[1,32], index: 8, kind: input, shape index: {}]   ;;  %s758_s9 = inlined_call_operand.vmem [shape: f32[1,32], index: 9, kind: input, shape index: {}]   ;;  %s759_s10 = inlined_call_operand.vmem [shape: f32[1,32], index: 10, kind: input, shape index: {}]   ;;  %s760_s11 = inlined_call_operand.hbm [shape: f32[16,32], index: 11, kind: output, shape index: {0}]   ;;  %s761_s12 = inlined_call_operand.hbm [shape: f32[16,32], index: 12, kind: output, shape index: {1}]  }
   0x1   :  { %19 = vsyncpa [#allocation6], 0 }
   0x2   :  { %20 = vsyncpa [#allocation9], 0 }
   0x3   :  { %21 = vsyncpa [#allocation4], 0 }
   0x4   :  { %22 = vsyncpa [#allocation13], 0  ;;  %s40_s23 = sshll.u32 %s750_s1, 4  ;;  %s583_s24 = smov [#allocation5]   ;;  %s41_s23 = int_to_ptr.hbm [resolvable:$true] %s40_s23 }
   0x5   :  { %s42_s25 = sshll.u32 %s583_s24, 4  ;;  %s66_s28 = sshll.u32 %s752_s3, 4  ;;  %s43_s25 = int_to_ptr.vmem [resolvable:$true] %s42_s25  ;;  %s67_s28 = int_to_ptr.hbm [resolvable:$true] %s66_s28 }
   0x6   :  { %s584_s29 = smov 128   ;;  %s585_s30 = smov 8  }
   0x7   :  { %48 = dma.hbm_to_vmem [thread:$0]  %s41_s23, 256, %s43_s25, [#allocation6], %s584_s29, %s584_s29, %s585_s30  }
   0x8   :  { %s586_s13 = smov [#allocation8]   ;;  %s27_s1 = sshll.u32 %s749_s0, 4  ;;  %s28_s1 = int_to_ptr.hbm [resolvable:$true] %s27_s1 }
   0x9   :  { %s68_s14 = sshll.u32 %s586_s13, 4  ;;  %s53_s18 = sshll.u32 %s751_s2, 4  ;;  %s69_s14 = int_to_ptr.vmem [resolvable:$true] %s68_s14  ;;  %s54_s18 = int_to_ptr.hbm [resolvable:$true] %s53_s18 }
   0xa   :  { %74 = dma.hbm_to_vmem [thread:$0]  %s67_s28, 512, %s69_s14, [#allocation9], %s584_s29, %s584_s29, %s585_s30  }
   0xb   :  { %s587_s19 = smov [#allocation2]   ;;  %s588_s21 = smov [#allocation7]  }
   0xc   :  { %s29_s20 = sshll.u32 %s587_s19, 4  ;;  %s55_s0 = sshll.u32 %s588_s21, 4  ;;  %s30_s20 = int_to_ptr.vmem [resolvable:$true] %s29_s20  ;;  %s56_s0 = int_to_ptr.vmem [resolvable:$true] %s55_s0 }
   0xd   :  { %35 = dma.hbm_to_vmem [thread:$0]  %s28_s1, 256, %s30_s20, [#allocation3], %s584_s29, %s584_s29, %s585_s30  }
   0xe   :  { %s85_s24 = sshll.u32 %s756_s7, 4  ;;  %s589_s2 = smov [#allocation10]   ;;  %s86_s24 = int_to_ptr.hbm [resolvable:$true] %s85_s24 }
   0xf   :  { %61 = dma.hbm_to_vmem [thread:$0]  %s54_s18, 256, %s56_s0, [#allocation6], %s584_s29, %s584_s29, %s585_s30  }
  0x10   :  { %s87_s25 = sshll.u32 %s589_s2, 4  ;;  %s88_s25 = int_to_ptr.vmem [resolvable:$true] %s87_s25 }
  0x11   :  { %93 = dma.hbm_to_vmem [thread:$0]  %s86_s24, 512, %s88_s25, [#allocation9], %s584_s29, %s584_s29, %s585_s30  }
  0x12   :  { %573 = dma.done.wait [#allocation3], 256  }
  0x13   :  { %574 = vsyncadd [#allocation3], 4294967040 }
  0x14   :  { %575 = dma.done.wait [#allocation6], 512  }
  0x15   :  { %576 = vsyncadd [#allocation6], 4294966784 }
  0x16   :  { %577 = dma.done.wait [#allocation9], 1024  }
  0x17   :  { %578 = vsyncadd [#allocation9], 4294966272  ;;  %v127_v0 = vld [vmem:[#allocation8 + $0x18] sm:$0xff]  ;;  %v126_v2 = vld [vmem:[#allocation8 + $0x10] sm:$0xff]  ;;  %vm134_vm0 = vcmask 261120   ;;  %v590_v32 = vmov 32.0  }
  0x18   :  { %v234_v1 = vld [vmem:[#allocation10 + $0x18] sm:$0xff]  ;;  %153 = vmatpush.msra.mxu0 %v127_v0  ;;  %v233_v3 = vld [vmem:[#allocation10 + $0x10] sm:$0xff]  ;;  %371 = vmatpush.msra.mxu2 %v127_v0  ;;  %v125_v4 = vld [vmem:[#allocation8 + $0x8] sm:$0xff]  ;;  %395 = vrcp.f32 %v590_v32  ;;  %s347_s17 = sshll.u32 %s761_s12, 4  ;;  %s592_s18 = smov [#allocation11]   ;;  %s348_s17 = int_to_ptr.hbm [resolvable:$true] %s347_s17 }
  0x19   :  { %259 = vmatpush.msra.mxu1 %v234_v1  ;;  %375 = vmatpush.msra.mxu3 %v234_v1  ;;  %v232_v5 = vld [vmem:[#allocation10 + $0x8] sm:$0xff]  ;;  %v124_v6 = vld [vmem:[#allocation8] sm:$0xff]  ;;  %v122_v8 = vld [vmem:[#allocation2] sm:$0xff]  ;;  %s332_s19 = sshll.u32 %s592_s18, 4  ;;  %s334_s0 = sshll.u32 %s760_s11, 4  ;;  %s333_s19 = int_to_ptr.vmem [resolvable:$true] %s332_s19  ;;  %s335_s0 = int_to_ptr.hbm [resolvable:$true] %s334_s0 }
  0x1a   :  { %154 = vmatpush.msra.mxu0 %v126_v2  ;;  %v231_v7 = vld [vmem:[#allocation10] sm:$0xff]  ;;  %372 = vmatpush.msra.mxu2 %v126_v2  ;;  %v123_v10 = vld [vmem:[#allocation2 + $0x8] sm:$0xff]  ;;  %v230_v11 = vld [vmem:[#allocation5 + $0x8] sm:$0xff] }
  0x1b   :  { %260 = vmatpush.msra.mxu1 %v233_v3  ;;  %376 = vmatpush.msra.mxu3 %v233_v3  ;;  %v229_v9 = vld [vmem:[#allocation5] sm:$0xff]  ;;  %v389_v12 = vld [vmem:[%s753_s4] ss:$0 sm:$0xff]  ;;  %v121_v25 = vld [vmem:[#allocation7 + $0x8] sm:$0xff] }
  0x1c   :  { %155 = vmatpush.msra.mxu0 %v125_v4  ;;  %373 = vmatpush.msra.mxu2 %v125_v4  ;;  %v390_v13 = vld [vmem:[%s757_s8] ss:$0 sm:$0xff] }
  0x1d   :  { %261 = vmatpush.msra.mxu1 %v232_v5  ;;  %377 = vmatpush.msra.mxu3 %v232_v5  ;;  %v120_v16 = vld [vmem:[#allocation7] sm:$0xff] }
  0x1e   :  { %156 = vmatpush.msra.mxu0 %v124_v6  ;;  %374 = vmatpush.msra.mxu2 %v124_v6  ;;  %v396_v33 = vpop.eup %395 }
  0x1f   :  { %262 = vmatpush.msra.mxu1 %v231_v7  ;;  %367 = vmatmul.msk.f32.vlgmr.msra.gmra.mxu0 %vm134_vm0, %v122_v8  ;;  %v173_v34 = vmul.f32 32.0, %v396_v33  ;;  %vm177_vm1 = vweird.f32 %v396_v33 }
  0x20   :  { %369 = vmatmul.msk.f32.vlgmr.msra.gmra.mxu1 %vm134_vm0, %v229_v9  ;;  %378 = vmatpush.msra.mxu3 %v231_v7 }
  0x21   :  { %368 = vmatmul.msk.f32.vlgmr.msra.gmra.mxu2 %vm134_vm0, %v123_v10  ;;  %370 = vmatmul.msk.f32.vlgmr.msra.gmra.mxu3 %vm134_vm0, %v230_v11  ;;  %v174_v35 = vsub.f32 1.0, %v173_v34 }
  0x23   :  { %v175_v36 = vmul.f32 %v396_v33, %v174_v35 }
  0x25   :  { %v176_v37 = vadd.f32 %v396_v33, %v175_v36 }
  0x27   :  { %v178_v38 = vsel %vm177_vm1, %v396_v33, %v176_v37  ;;  %v394_v33 = vld [vmem:[%s759_s10] ss:$0 sm:$0xff] }
  0x9c   :  { %v158_v14 = vpop.f32.mrf.mxu0 }
  0x9d   :  { %v264_v15 = vpop.f32.mrf.mxu1  ;;  %v159_v17 = vadd.f32 %v389_v12, %v158_v14 }
  0x9e   :  { %v265_v18 = vadd.f32 %v390_v13, %v264_v15 }
  0x9f   :  { %v164_v20 = vadd.f32 %v159_v17, %v120_v16 }
  0xa0   :  { %v270_v19 = vadd.f32 %v265_v18, %v120_v16 }
  0xa1   :  { %v166_v22 = vsel %vm134_vm0, %v164_v20, 0.0 }
  0xa2   :  { %v272_v21 = vsel %vm134_vm0, %v270_v19, 0.0  ;;  %167 = vadd.xlane.f32.xlu0 %v166_v22 }
  0xa3   :  { %273 = vadd.xlane.f32.xlu1 %v272_v21  ;;  %v391_v21 = vld [vmem:[%s754_s5] ss:$0 sm:$0xff] }
  0xa4   :  { %v161_v23 = vpop.f32.mrf.mxu2  ;;  %v267_v24 = vpop.f32.mrf.mxu3 }
  0xa5   :  { %v162_v26 = vadd.f32 %v389_v12, %v161_v23  ;;  %v268_v27 = vadd.f32 %v390_v13, %v267_v24 }
  0xa7   :  { %v271_v28 = vadd.f32 %v268_v27, %v121_v25  ;;  %v165_v29 = vadd.f32 %v162_v26, %v121_v25  ;;  %v392_v25 = vld [vmem:[%s758_s9] ss:$0 sm:$0xff] }
  0xa9   :  { %v275_v30 = vsel %vm134_vm0, %v271_v28, 0.0  ;;  %v169_v31 = vsel %vm134_vm0, %v165_v29, 0.0 }
  0xaa   :  { %170 = vadd.xlane.f32.xlu0 %v169_v31 }
  0xab   :  { %276 = vadd.xlane.f32.xlu1 %v275_v30  ;;  %v393_v30 = vld [vmem:[%s755_s6] ss:$0 sm:$0xff]  ;;  %s591_s6 = smov [#allocation12]  }
  0xac   :  { %s345_s9 = sshll.u32 %s591_s6, 4  ;;  %s346_s9 = int_to_ptr.vmem [resolvable:$true] %s345_s9 }
 0x115   :  { %v168_v40 = vpop.xlane.xlu0 %167 }
 0x116   :  { %v274_v39 = vpop.xlane.xlu1 %273  ;;  %v179_v42 = vmul.f32 %v178_v38, %v168_v40 }
 0x117   :  { %v278_v41 = vmul.f32 %v274_v39, %v178_v38 }
 0x118   :  { %v181_v44 = vsub.f32 %v164_v20, %v179_v42 }
 0x119   :  { %v702_v43 = vsub.f32 %v270_v19, %v278_v41 }
 0x11a   :  { %v183_v46 = vmul.f32 %v181_v44, %v181_v44 }
 0x11b   :  { %v282_v45 = vmul.f32 %v702_v43, %v702_v43 }
 0x11c   :  { %v185_v48 = vsel %vm134_vm0, %v183_v46, 0.0 }
 0x11d   :  { %v284_v47 = vsel %vm134_vm0, %v282_v45, 0.0  ;;  %186 = vadd.xlane.f32.xlu2 %v185_v48  ;;  %v171_v50 = vpop.xlane.xlu0 %170 }
 0x11e   :  { %v277_v49 = vpop.xlane.xlu1 %276  ;;  %285 = vadd.xlane.f32.xlu0 %v284_v47  ;;  %v180_v52 = vmul.f32 %v178_v38, %v171_v50 }
 0x11f   :  { %v279_v51 = vmul.f32 %v277_v49, %v178_v38 }
 0x120   :  { %v710_v54 = vsub.f32 %v165_v29, %v180_v52 }
 0x121   :  { %v708_v53 = vsub.f32 %v271_v28, %v279_v51 }
 0x122   :  { %v184_v56 = vmul.f32 %v710_v54, %v710_v54 }
 0x123   :  { %v283_v55 = vmul.f32 %v708_v53, %v708_v53 }
 0x124   :  { %v188_v58 = vsel %vm134_vm0, %v184_v56, 0.0 }
 0x125   :  { %v287_v57 = vsel %vm134_vm0, %v283_v55, 0.0  ;;  %189 = vadd.xlane.f32.xlu2 %v188_v58 }
 0x126   :  { %288 = vadd.xlane.f32.xlu1 %v287_v57 }
 0x190   :  { %v187_v59 = vpop.xlane.xlu2 %186 }
 0x191   :  { %v286_v60 = vpop.xlane.xlu0 %285  ;;  %v191_v61 = vmul.f32 %v187_v59, %v178_v38 }
 0x192   :  { %v290_v62 = vmul.f32 %v286_v60, %v178_v38 }
 0x193   :  { %v193_v63 = vadd.f32 1e-12, %v191_v61 }
 0x194   :  { %v292_v0 = vadd.f32 1e-12, %v290_v62 }
 0x195   :  { %397 = vrsqrt.f32 %v193_v63  ;;  %vm201_vm4 = vweird.f32 %v193_v63 }
 0x196   :  { %399 = vrsqrt.f32 %v292_v0  ;;  %vm300_vm6 = vweird.f32 %v292_v0 }
 0x198   :  { %v190_v2 = vpop.xlane.xlu2 %189 }
 0x199   :  { %v289_v1 = vpop.xlane.xlu1 %288  ;;  %v192_v4 = vmul.f32 %v190_v2, %v178_v38 }
 0x19a   :  { %v291_v3 = vmul.f32 %v289_v1, %v178_v38 }
 0x19b   :  { %v398_v5 = vpop.eup %397  ;;  %v194_v7 = vadd.f32 1e-12, %v192_v4 }
 0x19c   :  { %v293_v6 = vadd.f32 1e-12, %v291_v3  ;;  %v400_v8 = vpop.eup %399  ;;  %v196_v9 = vmul.f32 %v398_v5, %v193_v63  ;;  %vm202_vm2 = vweird.f32 %v398_v5 }
 0x19d   :  { %v295_v10 = vmul.f32 %v400_v8, %v292_v0  ;;  %vm301_vm3 = vweird.f32 %v400_v8  ;;  %vm203_vm5 = vmor %vm201_vm4, %vm202_vm2  ;;  %vm211_vm12 = vweird.f32 %v194_v7 }
 0x19e   :  { %401 = vrsqrt.f32 %v293_v6  ;;  %v197_v11 = vmul.f32 %v398_v5, %v196_v9  ;;  %vm302_vm7 = vmor %vm300_vm6, %vm301_vm3  ;;  %vm310_vm10 = vweird.f32 %v293_v6 }
 0x19f   :  { %403 = vrsqrt.f32 %v194_v7  ;;  %v296_v12 = vmul.f32 %v400_v8, %v295_v10 }
 0x1a0   :  { %v198_v13 = vmul.f32 0.5, %v197_v11 }
 0x1a1   :  { %v297_v14 = vmul.f32 0.5, %v296_v12 }
 0x1a2   :  { %v199_v15 = vsub.f32 1.5, %v198_v13 }
 0x1a3   :  { %v298_v17 = vsub.f32 1.5, %v297_v14 }
 0x1a4   :  { %v402_v16 = vpop.eup %401  ;;  %v200_v19 = vmul.f32 %v398_v5, %v199_v15 }
 0x1a5   :  { %v404_v18 = vpop.eup %403  ;;  %v305_v20 = vmul.f32 %v402_v16, %v293_v6  ;;  %v299_v22 = vmul.f32 %v400_v8, %v298_v17  ;;  %vm311_vm8 = vweird.f32 %v402_v16 }
 0x1a6   :  { %v206_v23 = vmul.f32 %v404_v18, %v194_v7  ;;  %v204_v24 = vsel %vm203_vm5, %v398_v5, %v200_v19  ;;  %vm212_vm9 = vweird.f32 %v404_v18  ;;  %vm312_vm11 = vmor %vm310_vm10, %vm311_vm8 }
 0x1a7   :  { %v306_v26 = vmul.f32 %v402_v16, %v305_v20  ;;  %v215_v27 = vmul.f32 %v204_v24, %v181_v44  ;;  %v303_v28 = vsel %vm302_vm7, %v400_v8, %v299_v22  ;;  %vm213_vm13 = vmor %vm211_vm12, %vm212_vm9 }
 0x1a8   :  { %v207_v29 = vmul.f32 %v404_v18, %v206_v23  ;;  %v314_v31 = vmul.f32 %v303_v28, %v702_v43 }
 0x1a9   :  { %v307_v32 = vmul.f32 0.5, %v306_v26  ;;  %v220_v34 = vmul.f32 %v391_v21, %v215_v27 }
 0x1aa   :  { %v208_v35 = vmul.f32 0.5, %v207_v29  ;;  %v319_v36 = vmul.f32 %v392_v25, %v314_v31 }
 0x1ab   :  { %v308_v37 = vsub.f32 1.5, %v307_v32  ;;  %v225_v39 = vadd.f32 %v393_v30, %v220_v34 }
 0x1ac   :  { %v209_v38 = vsub.f32 1.5, %v208_v35  ;;  %v324_v41 = vadd.f32 %v394_v33, %v319_v36 }
 0x1ad   :  { %v309_v40 = vmul.f32 %v402_v16, %v308_v37  ;;  %227 = vst.msk [vmem:[#allocation11] sm:$0xff] %vm134_vm0, %v225_v39 }
 0x1ae   :  { %v210_v42 = vmul.f32 %v404_v18, %v209_v38  ;;  %326 = vst.msk [vmem:[#allocation12] sm:$0xff] %vm134_vm0, %v324_v41 }
 0x1af   :  { %v313_v43 = vsel %vm312_vm11, %v402_v16, %v309_v40 }
 0x1b0   :  { %v315_v44 = vmul.f32 %v313_v43, %v708_v53  ;;  %v214_v45 = vsel %vm213_vm13, %v404_v18, %v210_v42 }
 0x1b1   :  { %v216_v46 = vmul.f32 %v214_v45, %v710_v54 }
 0x1b2   :  { %v320_v47 = vmul.f32 %v392_v25, %v315_v44 }
 0x1b3   :  { %v221_v48 = vmul.f32 %v391_v21, %v216_v46 }
 0x1b4   :  { %v325_v49 = vadd.f32 %v394_v33, %v320_v47 }
 0x1b5   :  { %v226_v50 = vadd.f32 %v393_v30, %v221_v48 }
 0x1b6   :  { %327 = vst.msk [vmem:[#allocation12 + $0x8] sm:$0xff] %vm134_vm0, %v325_v49 }
 0x1b7   :  { %228 = vst.msk [vmem:[#allocation11 + $0x8] sm:$0xff] %vm134_vm0, %v226_v50  ;;  %353 = dma.vmem_to_hbm [thread:$0]  %s346_s9, 256, %s348_s17, [#allocation13], %s584_s29, %s584_s29, %s585_s30  }
 0x1b8   :  { %340 = dma.vmem_to_hbm [thread:$0]  %s333_s19, 256, %s335_s0, [#allocation4], %s584_s29, %s584_s29, %s585_s30  }
 0x1b9   :  { %579 = dma.done.wait [#allocation4], 256  }
 0x1ba   :  { %580 = vsyncadd [#allocation4], 4294967040 }
 0x1bb   :  { %581 = dma.done.wait [#allocation13], 256  }
 0x1bc   :  { %582 = vsyncadd [#allocation13], 4294967040 }
 0x1bd   :  { %362 = vsyncpa [#allocation3], 1 }
 0x1be   :  { %363 = vsyncpa [#allocation6], 1 }
 0x1bf   :  { %364 = vsyncpa [#allocation9], 1 }
 0x1c0   :  { %365 = vsyncpa [#allocation4], 1 }
 0x1c1   :  { %366 = vsyncpa [#allocation13], 1 }

</bundles_post_ra>
